<compile_context>
chip_gen: v7x
topology: tpu7x:2x2x1
jax: 0.10.0
libtpu: 0.0.40
codegen_flags: <defaults>
</compile_context>

<pallas_src>
import functools
import math

import jax
import jax.numpy as jnp
from jax.experimental import pallas as pl
from jax.experimental.pallas import tpu as pltpu


# ----------------------------------------------------------------------------
# helpers
# ----------------------------------------------------------------------------
def _round_up(a, b):
    return ((a + b - 1) // b) * b


def _pick_tile_m(m, max_tile=256):
    # MXU-friendly row tile: multiple of 8 sublanes, capped so double-buffered
    # tiles stay well inside the scoped VMEM budget on every generation.
    return min(max_tile, _round_up(m, 8))


# ----------------------------------------------------------------------------
# kernels
# ----------------------------------------------------------------------------
def _linear_kernel(x_ref, w_ref, b_ref, o_ref):
    y = jnp.dot(x_ref[...], w_ref[...], preferred_element_type=jnp.float32)
    y = y + b_ref[...]
    o_ref[...] = y.astype(o_ref.dtype)


def _linear_residual_kernel(x_ref, w_ref, b_ref, r_ref, o_ref):
    y = jnp.dot(x_ref[...], w_ref[...], preferred_element_type=jnp.float32)
    y = y + b_ref[...] + r_ref[...].astype(jnp.float32)
    o_ref[...] = y.astype(o_ref.dtype)


def _layernorm_kernel(x_ref, g_ref, b_ref, o_ref, *, eps):
    x = x_ref[...].astype(jnp.float32)
    d = x.shape[-1]
    mean = jnp.mean(x, axis=-1, keepdims=True)
    cen = x - mean
    var = jnp.sum(cen * cen, axis=-1, keepdims=True) / (d - 1)  # torch.std unbiased
    std = jnp.sqrt(var)
    y = g_ref[...] * cen / (std + eps) + b_ref[...]
    o_ref[...] = y.astype(o_ref.dtype)


def _attention_kernel(q_ref, k_ref, v_ref, o_ref, *, scale):
    # One (batch, head) pair per grid step.
    q = q_ref[0].astype(jnp.float32)          # (Sq, dk)
    k = k_ref[0].astype(jnp.float32)          # (Sk, dk)
    v = v_ref[0]                              # (Sk, dk)
    s = jax.lax.dot_general(q, k, (((1,), (1,)), ((), ())),
                            preferred_element_type=jnp.float32) * scale
    s = s - jnp.max(s, axis=-1, keepdims=True)
    p = jnp.exp(s)
    p = p / jnp.sum(p, axis=-1, keepdims=True)
    o = jnp.dot(p.astype(v.dtype), v, preferred_element_type=jnp.float32)
    o_ref[0] = o.astype(o_ref.dtype)


def _ffn_residual_kernel(x_ref, w1_ref, b1_ref, w2_ref, b2_ref, r_ref, o_ref):
    h = jnp.dot(x_ref[...], w1_ref[...], preferred_element_type=jnp.float32)
    h = jnp.maximum(h + b1_ref[...], 0.0)
    y = jnp.dot(h.astype(w2_ref.dtype), w2_ref[...],
                preferred_element_type=jnp.float32)
    y = y + b2_ref[...] + r_ref[...].astype(jnp.float32)
    o_ref[...] = y.astype(o_ref.dtype)


# ----------------------------------------------------------------------------
# pallas_call wrappers
# ----------------------------------------------------------------------------
_PAR1 = pltpu.CompilerParams(dimension_semantics=("parallel",))


def linear(x2d, w, b, residual=None, *, max_tile_m=256):
    """y = x @ w + b (+ residual).  x2d: (M, K), w: (K, N), b: (N,)."""
    m, k = x2d.shape
    n = w.shape[1]
    tm = _pick_tile_m(m, max_tile_m)
    mp = _round_up(m, tm)
    xp = jnp.pad(x2d, ((0, mp - m), (0, 0))) if mp != m else x2d
    b2 = b.reshape(1, n)
    grid = (mp // tm,)
    x_spec = pl.BlockSpec((tm, k), lambda i: (i, 0))
    w_spec = pl.BlockSpec((k, n), lambda i: (0, 0))
    b_spec = pl.BlockSpec((1, n), lambda i: (0, 0))
    o_spec = pl.BlockSpec((tm, n), lambda i: (i, 0))
    out_shape = jax.ShapeDtypeStruct((mp, n), x2d.dtype)

    if residual is None:
        out = pl.pallas_call(
            _linear_kernel,
            out_shape=out_shape,
            grid_spec=pltpu.PrefetchScalarGridSpec(
                num_scalar_prefetch=0, grid=grid,
                in_specs=[x_spec, w_spec, b_spec], out_specs=o_spec),
            compiler_params=_PAR1,
        )(xp, w, b2)
    else:
        rp = jnp.pad(residual, ((0, mp - m), (0, 0))) if mp != m else residual
        out = pl.pallas_call(
            _linear_residual_kernel,
            out_shape=out_shape,
            grid_spec=pltpu.PrefetchScalarGridSpec(
                num_scalar_prefetch=0, grid=grid,
                in_specs=[x_spec, w_spec, b_spec,
                          pl.BlockSpec((tm, n), lambda i: (i, 0))],
                out_specs=o_spec),
            compiler_params=_PAR1,
        )(xp, w, b2, rp)
    return out[:m] if mp != m else out


def layernorm(x2d, gamma, beta, *, eps=1e-6, max_tile_m=256):
    m, d = x2d.shape
    tm = _pick_tile_m(m, max_tile_m)
    mp = _round_up(m, tm)
    xp = jnp.pad(x2d, ((0, mp - m), (0, 0))) if mp != m else x2d
    out = pl.pallas_call(
        functools.partial(_layernorm_kernel, eps=eps),
        out_shape=jax.ShapeDtypeStruct((mp, d), x2d.dtype),
        grid_spec=pltpu.PrefetchScalarGridSpec(
            num_scalar_prefetch=0, grid=(mp // tm,),
            in_specs=[pl.BlockSpec((tm, d), lambda i: (i, 0)),
                      pl.BlockSpec((1, d), lambda i: (0, 0)),
                      pl.BlockSpec((1, d), lambda i: (0, 0))],
            out_specs=pl.BlockSpec((tm, d), lambda i: (i, 0))),
        compiler_params=_PAR1,
    )(xp, gamma.reshape(1, d), beta.reshape(1, d))
    return out[:m] if mp != m else out


def attention_core(q, k, v):
    """q: (G, Sq, dk); k, v: (G, Sk, dk) -> (G, Sq, dk), G = batch*heads."""
    g, sq, dk = q.shape
    sk = k.shape[1]
    scale = 1.0 / math.sqrt(dk)
    return pl.pallas_call(
        functools.partial(_attention_kernel, scale=scale),
        out_shape=jax.ShapeDtypeStruct((g, sq, dk), q.dtype),
        grid_spec=pltpu.PrefetchScalarGridSpec(
            num_scalar_prefetch=0, grid=(g,),
            in_specs=[pl.BlockSpec((1, sq, dk), lambda i: (i, 0, 0)),
                      pl.BlockSpec((1, sk, dk), lambda i: (i, 0, 0)),
                      pl.BlockSpec((1, sk, dk), lambda i: (i, 0, 0))],
            out_specs=pl.BlockSpec((1, sq, dk), lambda i: (i, 0, 0))),
        compiler_params=_PAR1,
    )(q, k, v)


def multi_head_attention(q_in, k_in, v_in, p, n_heads, residual=None):
    b, sq, d = q_in.shape
    sk = k_in.shape[1]
    dk = d // n_heads

    def proj(x3, w, bias, s):
        y = linear(x3.reshape(b * s, d), w, bias)
        return (y.reshape(b, s, n_heads, dk)
                 .transpose(0, 2, 1, 3)
                 .reshape(b * n_heads, s, dk))

    q = proj(q_in, p["wq"], p["bq"], sq)
    k = proj(k_in, p["wk"], p["bk"], sk)
    v = proj(v_in, p["wv"], p["bv"], sk)

    o = attention_core(q, k, v)
    o = (o.reshape(b, n_heads, sq, dk)
          .transpose(0, 2, 1, 3)
          .reshape(b * sq, d))

    r2 = residual.reshape(b * sq, d) if residual is not None else None
    out = linear(o, p["wo"], p["bo"], residual=r2)
    return out.reshape(b, sq, d)


def feed_forward_residual(xn3, p, residual3, *, max_tile_m=256):
    b, s, d = xn3.shape
    f = p["w1"].shape[1]
    m = b * s
    tm = _pick_tile_m(m, max_tile_m)
    mp = _round_up(m, tm)
    x2 = xn3.reshape(m, d)
    r2 = residual3.reshape(m, d)
    if mp != m:
        x2 = jnp.pad(x2, ((0, mp - m), (0, 0)))
        r2 = jnp.pad(r2, ((0, mp - m), (0, 0)))
    out = pl.pallas_call(
        _ffn_residual_kernel,
        out_shape=jax.ShapeDtypeStruct((mp, d), xn3.dtype),
        grid_spec=pltpu.PrefetchScalarGridSpec(
            num_scalar_prefetch=0, grid=(mp // tm,),
            in_specs=[pl.BlockSpec((tm, d), lambda i: (i, 0)),
                      pl.BlockSpec((d, f), lambda i: (0, 0)),
                      pl.BlockSpec((1, f), lambda i: (0, 0)),
                      pl.BlockSpec((f, d), lambda i: (0, 0)),
                      pl.BlockSpec((1, d), lambda i: (0, 0)),
                      pl.BlockSpec((tm, d), lambda i: (i, 0))],
            out_specs=pl.BlockSpec((tm, d), lambda i: (i, 0))),
        compiler_params=_PAR1,
    )(x2, p["w1"], p["b1"].reshape(1, f), p["w2"], p["b2"].reshape(1, d), r2)
    out = out[:m] if mp != m else out
    return out.reshape(b, s, d)


# ----------------------------------------------------------------------------
# EncoderLayer forward
# ----------------------------------------------------------------------------
def encoder_layer_forward(x, text_features, gcn_query, mask, params, *, n_heads):
    # TODO(synk): attention mask (scores.masked_fill(mask==0, -1e9)) and dropout
    # are not implemented; this is inference-mode with mask=None.
    del mask
    b, s, d = x.shape

    # sublayer[0]: x = x + self_attn(LN0(x), LN0(x), LN0(x))
    xn = layernorm(x.reshape(b * s, d), params["ln0_g"], params["ln0_b"]).reshape(b, s, d)
    x = multi_head_attention(xn, xn, xn, params["attn1"], n_heads, residual=x)
    x_self = x

    # sublayer[1]: x = x + self_attn2(LN1(x), gcn_query, gcn_query)
    xn = layernorm(x.reshape(b * s, d), params["ln1_g"], params["ln1_b"]).reshape(b, s, d)
    x = multi_head_attention(xn, gcn_query, gcn_query, params["attn2"], n_heads, residual=x)

    # concat along the sequence dim -> keys/values of length 2*s for attn3
    x_cat = jnp.concatenate([x, x_self], axis=1)

    # self_attn3(text_features, x_cat, x_cat): no pre-norm, no residual
    x = multi_head_attention(text_features, x_cat, x_cat, params["attn3"], n_heads,
                             residual=None)

    # sublayer[2]: out = x + feed_forward(LN2(x))
    bt, st, _ = x.shape
    xn = layernorm(x.reshape(bt * st, d), params["ln2_g"], params["ln2_b"]).reshape(bt, st, d)
    return feed_forward_residual(xn, params["ff"], x)


# ----------------------------------------------------------------------------
# parameter init (mimics nn.Linear defaults, weights stored [in, out])
# ----------------------------------------------------------------------------
def _init_linear(key, fan_in, fan_out, dtype):
    kw, kb = jax.random.split(key)
    bound = 1.0 / math.sqrt(fan_in)
    w = jax.random.uniform(kw, (fan_in, fan_out), dtype, -bound, bound)
    b = jax.random.uniform(kb, (fan_out,), dtype, -bound, bound)
    return w, b


def init_params(key, d_model, d_ff, dtype=jnp.float32):
    keys = jax.random.split(key, 5)

    def attn_params(k4):
        ks = jax.random.split(k4, 4)
        wq, bq = _init_linear(ks[0], d_model, d_model, dtype)
        wk, bk = _init_linear(ks[1], d_model, d_model, dtype)
        wv, bv = _init_linear(ks[2], d_model, d_model, dtype)
        wo, bo = _init_linear(ks[3], d_model, d_model, dtype)
        return dict(wq=wq, bq=bq, wk=wk, bk=bk, wv=wv, bv=bv, wo=wo, bo=bo)

    w1, b1 = _init_linear(keys[3], d_model, d_ff, dtype)
    w2, b2 = _init_linear(keys[4], d_ff, d_model, dtype)
    return dict(
        attn1=attn_params(keys[0]),
        attn2=attn_params(keys[1]),
        attn3=attn_params(keys[2]),
        ff=dict(w1=w1, b1=b1, w2=w2, b2=b2),
        ln0_g=jnp.ones((d_model,), dtype), ln0_b=jnp.zeros((d_model,), dtype),
        ln1_g=jnp.ones((d_model,), dtype), ln1_b=jnp.zeros((d_model,), dtype),
        ln2_g=jnp.ones((d_model,), dtype), ln2_b=jnp.zeros((d_model,), dtype),
    )


# ----------------------------------------------------------------------------
# pure-JAX reference
# ----------------------------------------------------------------------------
def _ref_layernorm(x, g, b, eps=1e-6):
    mean = jnp.mean(x, axis=-1, keepdims=True)
    var = jnp.sum((x - mean) ** 2, axis=-1, keepdims=True) / (x.shape[-1] - 1)
    return g * (x - mean) / (jnp.sqrt(var) + eps) + b


def _ref_mha(q_in, k_in, v_in, p, h):
    b, sq, d = q_in.shape
    sk = k_in.shape[1]
    dk = d // h

    def proj(x, w, bias, s):
        return (x @ w + bias).reshape(b, s, h, dk).transpose(0, 2, 1, 3)

    q = proj(q_in, p["wq"], p["bq"], sq)
    k = proj(k_in, p["wk"], p["bk"], sk)
    v = proj(v_in, p["wv"], p["bv"], sk)
    s = jnp.einsum("bhqd,bhkd->bhqk", q, k) / math.sqrt(dk)
    a = jax.nn.softmax(s, axis=-1)
    o = jnp.einsum("bhqk,bhkd->bhqd", a, v).transpose(0, 2, 1, 3).reshape(b, sq, d)
    return o @ p["wo"] + p["bo"]


def _ref_encoder_layer(x, text_features, gcn_query, params, h):
    xn = _ref_layernorm(x, params["ln0_g"], params["ln0_b"])
    x = x + _ref_mha(xn, xn, xn, params["attn1"], h)
    x_self = x
    xn = _ref_layernorm(x, params["ln1_g"], params["ln1_b"])
    x = x + _ref_mha(xn, gcn_query, gcn_query, params["attn2"], h)
    x_cat = jnp.concatenate([x, x_self], axis=1)
    x = _ref_mha(text_features, x_cat, x_cat, params["attn3"], h)
    xn = _ref_layernorm(x, params["ln2_g"], params["ln2_b"])
    ff = params["ff"]
    y = jnp.maximum(xn @ ff["w1"] + ff["b1"], 0.0) @ ff["w2"] + ff["b2"]
    return x + y


# ----------------------------------------------------------------------------
if __name__ == "__main__":
    B, S, S_TEXT, S_GCN = 2, 8, 8, 8
    D_MODEL, N_HEADS, D_FF = 32, 4, 64

    key = jax.random.PRNGKey(0)
    kx, kt, kg, kp = jax.random.split(key, 4)
    x = jax.random.normal(kx, (B, S, D_MODEL), jnp.float32)
    text_features = jax.random.normal(kt, (B, S_TEXT, D_MODEL), jnp.float32)
    gcn_query = jax.random.normal(kg, (B, S_GCN, D_MODEL), jnp.float32)
    params = init_params(kp, D_MODEL, D_FF)

    fwd = jax.jit(functools.partial(encoder_layer_forward, n_heads=N_HEADS))
    out = fwd(x, text_features, gcn_query, None, params)
    jax.block_until_ready(out)

    ref = _ref_encoder_layer(x, text_features, gcn_query, params, N_HEADS)
    assert out.shape == (B, S_TEXT, D_MODEL)
    err = float(jnp.max(jnp.abs(out - ref)))
    assert err < 1e-2, err

    print("KERNEL_OK")
</pallas_src>

<mosaic_0001>
module attributes {stable_mosaic.version = 11 : i64} {
  func.func @_layernorm_kernel(%arg0: i32, %arg1: memref<16x32xf32, #tpu.memory_space<vmem>>, %arg2: memref<1x32xf32, #tpu.memory_space<vmem>>, %arg3: memref<1x32xf32, #tpu.memory_space<vmem>>, %arg4: memref<16x32xf32, #tpu.memory_space<vmem>>) attributes {dimension_semantics = [#tpu.dimension_semantics<parallel>], iteration_bounds = array<i64: 1>, scalar_prefetch = 0 : i64, scratch_operands = 0 : i64, tpu.core_type = #tpu.core_type<tc>, window_params = [{transform_indices = @transform_0, window_bounds = array<i64: 16, 32>}, {pipeline_mode = #tpu.pipeline_mode<synchronous>, transform_indices = @transform_1, window_bounds = array<i64: 1, 32>}, {pipeline_mode = #tpu.pipeline_mode<synchronous>, transform_indices = @transform_2, window_bounds = array<i64: 1, 32>}, {transform_indices = @transform_3, window_bounds = array<i64: 16, 32>}]} {
    %c0 = arith.constant 0 : index
    %c0_0 = arith.constant 0 : index
    %0 = vector.load %arg1[%c0, %c0_0] : memref<16x32xf32, #tpu.memory_space<vmem>>, vector<16x32xf32>
    %cst = arith.constant dense<0.000000e+00> : vector<16xf32>
    %1 = vector.multi_reduction <add>, %0, %cst [1] : vector<16x32xf32> to vector<16xf32>
    %2 = vector.shape_cast %1 : vector<16xf32> to vector<16x1xf32>
    %cst_1 = arith.constant 3.200000e+01 : f32
    %3 = vector.broadcast %cst_1 : f32 to vector<16x1xf32>
    %4 = arith.divf %2, %3 : vector<16x1xf32>
    %5 = vector.broadcast %4 : vector<16x1xf32> to vector<16x32xf32>
    %6 = arith.subf %0, %5 : vector<16x32xf32>
    %7 = arith.mulf %6, %6 : vector<16x32xf32>
    %cst_2 = arith.constant dense<0.000000e+00> : vector<16xf32>
    %8 = vector.multi_reduction <add>, %7, %cst_2 [1] : vector<16x32xf32> to vector<16xf32>
    %9 = vector.shape_cast %8 : vector<16xf32> to vector<16x1xf32>
    %cst_3 = arith.constant 3.100000e+01 : f32
    %10 = vector.broadcast %cst_3 : f32 to vector<16x1xf32>
    %11 = arith.divf %9, %10 : vector<16x1xf32>
    %12 = math.sqrt %11 : vector<16x1xf32>
    %c0_4 = arith.constant 0 : index
    %c0_5 = arith.constant 0 : index
    %13 = vector.load %arg2[%c0_4, %c0_5] : memref<1x32xf32, #tpu.memory_space<vmem>>, vector<1x32xf32>
    %14 = vector.broadcast %13 : vector<1x32xf32> to vector<16x32xf32>
    %15 = arith.mulf %14, %6 : vector<16x32xf32>
    %cst_6 = arith.constant 9.99999997E-7 : f32
    %16 = vector.broadcast %cst_6 : f32 to vector<16x1xf32>
    %17 = arith.addf %12, %16 : vector<16x1xf32>
    %18 = vector.broadcast %17 : vector<16x1xf32> to vector<16x32xf32>
    %19 = arith.divf %15, %18 : vector<16x32xf32>
    %c0_7 = arith.constant 0 : index
    %c0_8 = arith.constant 0 : index
    %20 = vector.load %arg3[%c0_7, %c0_8] : memref<1x32xf32, #tpu.memory_space<vmem>>, vector<1x32xf32>
    %21 = vector.broadcast %20 : vector<1x32xf32> to vector<16x32xf32>
    %22 = arith.addf %19, %21 : vector<16x32xf32>
    %c0_9 = arith.constant 0 : index
    %c0_10 = arith.constant 0 : index
    %23 = vector.load %arg4[%c0_9, %c0_10] : memref<16x32xf32, #tpu.memory_space<vmem>>, vector<16x32xf32>
    tpu.vector_store %arg4[%c0_9, %c0_10], %22 {strides = array<i32>} : memref<16x32xf32, #tpu.memory_space<vmem>>, vector<16x32xf32>,
    return
  }
  func.func @transform_0(%arg0: i32) -> (i32, i32) {
    %c0_i32 = arith.constant 0 : i32
    %c0_i32_0 = arith.constant 0 : i32
    return %arg0, %c0_i32 : i32, i32
  }
  func.func @transform_1(%arg0: i32) -> (i32, i32) {
    %c0_i32 = arith.constant 0 : i32
    %c0_i32_0 = arith.constant 0 : i32
    %c0_i32_1 = arith.constant 0 : i32
    return %c0_i32, %c0_i32_0 : i32, i32
  }
  func.func @transform_2(%arg0: i32) -> (i32, i32) {
    %c0_i32 = arith.constant 0 : i32
    %c0_i32_0 = arith.constant 0 : i32
    %c0_i32_1 = arith.constant 0 : i32
    return %c0_i32, %c0_i32_0 : i32, i32
  }
  func.func @transform_3(%arg0: i32) -> (i32, i32) {
    %c0_i32 = arith.constant 0 : i32
    %c0_i32_0 = arith.constant 0 : i32
    return %arg0, %c0_i32 : i32, i32
  }
}

module attributes {stable_mosaic.version = 11 : i64} {
  func.func @_linear_kernel(%arg0: i32, %arg1: memref<16x32xf32, #tpu.memory_space<vmem>>, %arg2: memref<32x32xf32, #tpu.memory_space<vmem>>, %arg3: memref<1x32xf32, #tpu.memory_space<vmem>>, %arg4: memref<16x32xf32, #tpu.memory_space<vmem>>) attributes {dimension_semantics = [#tpu.dimension_semantics<parallel>], iteration_bounds = array<i64: 1>, scalar_prefetch = 0 : i64, scratch_operands = 0 : i64, tpu.core_type = #tpu.core_type<tc>, window_params = [{transform_indices = @transform_0, window_bounds = array<i64: 16, 32>}, {pipeline_mode = #tpu.pipeline_mode<synchronous>, transform_indices = @transform_1, window_bounds = array<i64: 32, 32>}, {pipeline_mode = #tpu.pipeline_mode<synchronous>, transform_indices = @transform_2, window_bounds = array<i64: 1, 32>}, {transform_indices = @transform_3, window_bounds = array<i64: 16, 32>}]} {
    %c0 = arith.constant 0 : index
    %c0_0 = arith.constant 0 : index
    %0 = vector.load %arg1[%c0, %c0_0] : memref<16x32xf32, #tpu.memory_space<vmem>>, vector<16x32xf32>
    %c0_1 = arith.constant 0 : index
    %c0_2 = arith.constant 0 : index
    %1 = vector.load %arg2[%c0_1, %c0_2] : memref<32x32xf32, #tpu.memory_space<vmem>>, vector<32x32xf32>
    %cst = arith.constant dense<0.000000e+00> : vector<16x32xf32>
    %2 = tpu.matmul %0, %1, %cst {dimension_numbers = #tpu.dot_dimension_numbers<[1], [0], [0], [1], [0, 0, 1, 1], [], []>} : vector<16x32xf32>, vector<32x32xf32>, vector<16x32xf32> -> vector<16x32xf32>
    %c0_3 = arith.constant 0 : index
    %c0_4 = arith.constant 0 : index
    %3 = vector.load %arg3[%c0_3, %c0_4] : memref<1x32xf32, #tpu.memory_space<vmem>>, vector<1x32xf32>
    %4 = vector.broadcast %3 : vector<1x32xf32> to vector<16x32xf32>
    %5 = arith.addf %2, %4 : vector<16x32xf32>
    %c0_5 = arith.constant 0 : index
    %c0_6 = arith.constant 0 : index
    %6 = vector.load %arg4[%c0_5, %c0_6] : memref<16x32xf32, #tpu.memory_space<vmem>>, vector<16x32xf32>
    tpu.vector_store %arg4[%c0_5, %c0_6], %5 {strides = array<i32>} : memref<16x32xf32, #tpu.memory_space<vmem>>, vector<16x32xf32>,
    return
  }
  func.func @transform_0(%arg0: i32) -> (i32, i32) {
    %c0_i32 = arith.constant 0 : i32
    %c0_i32_0 = arith.constant 0 : i32
    return %arg0, %c0_i32 : i32, i32
  }
  func.func @transform_1(%arg0: i32) -> (i32, i32) {
    %c0_i32 = arith.constant 0 : i32
    %c0_i32_0 = arith.constant 0 : i32
    %c0_i32_1 = arith.constant 0 : i32
    return %c0_i32, %c0_i32_0 : i32, i32
  }
  func.func @transform_2(%arg0: i32) -> (i32, i32) {
    %c0_i32 = arith.constant 0 : i32
    %c0_i32_0 = arith.constant 0 : i32
    %c0_i32_1 = arith.constant 0 : i32
    return %c0_i32, %c0_i32_0 : i32, i32
  }
  func.func @transform_3(%arg0: i32) -> (i32, i32) {
    %c0_i32 = arith.constant 0 : i32
    %c0_i32_0 = arith.constant 0 : i32
    return %arg0, %c0_i32 : i32, i32
  }
}

module attributes {stable_mosaic.version = 11 : i64} {
  func.func @_attention_kernel(%arg0: i32, %arg1: memref<1x8x8xf32, #tpu.memory_space<vmem>>, %arg2: memref<1x8x8xf32, #tpu.memory_space<vmem>>, %arg3: memref<1x8x8xf32, #tpu.memory_space<vmem>>, %arg4: memref<1x8x8xf32, #tpu.memory_space<vmem>>) attributes {dimension_semantics = [#tpu.dimension_semantics<parallel>], iteration_bounds = array<i64: 8>, scalar_prefetch = 0 : i64, scratch_operands = 0 : i64, tpu.core_type = #tpu.core_type<tc>, window_params = [{transform_indices = @transform_0, window_bounds = array<i64: 1, 8, 8>}, {transform_indices = @transform_1, window_bounds = array<i64: 1, 8, 8>}, {transform_indices = @transform_2, window_bounds = array<i64: 1, 8, 8>}, {transform_indices = @transform_3, window_bounds = array<i64: 1, 8, 8>}]} {
    %c0 = arith.constant 0 : index
    %c0_0 = arith.constant 0 : index
    %c0_1 = arith.constant 0 : index
    %0 = vector.load %arg1[%c0, %c0_0, %c0_1] : memref<1x8x8xf32, #tpu.memory_space<vmem>>, vector<1x8x8xf32>
    %1 = vector.shape_cast %0 : vector<1x8x8xf32> to vector<8x8xf32>
    %c0_2 = arith.constant 0 : index
    %c0_3 = arith.constant 0 : index
    %c0_4 = arith.constant 0 : index
    %2 = vector.load %arg2[%c0_2, %c0_3, %c0_4] : memref<1x8x8xf32, #tpu.memory_space<vmem>>, vector<1x8x8xf32>
    %3 = vector.shape_cast %2 : vector<1x8x8xf32> to vector<8x8xf32>
    %c0_5 = arith.constant 0 : index
    %c0_6 = arith.constant 0 : index
    %c0_7 = arith.constant 0 : index
    %4 = vector.load %arg3[%c0_5, %c0_6, %c0_7] : memref<1x8x8xf32, #tpu.memory_space<vmem>>, vector<1x8x8xf32>
    %5 = vector.shape_cast %4 : vector<1x8x8xf32> to vector<8x8xf32>
    %cst = arith.constant dense<0.000000e+00> : vector<8x8xf32>
    %6 = tpu.matmul %1, %3, %cst {dimension_numbers = #tpu.dot_dimension_numbers<[1], [1], [0], [0], [0, 0, 1, 0], [], []>} : vector<8x8xf32>, vector<8x8xf32>, vector<8x8xf32> -> vector<8x8xf32>
    %cst_8 = arith.constant 0.353553385 : f32
    %7 = vector.broadcast %cst_8 : f32 to vector<8x8xf32>
    %8 = arith.mulf %6, %7 : vector<8x8xf32>
    %cst_9 = arith.constant dense<0xFF800000> : vector<8xf32>
    %9 = vector.multi_reduction <maximumf>, %8, %cst_9 [1] : vector<8x8xf32> to vector<8xf32>
    %10 = vector.shape_cast %9 : vector<8xf32> to vector<8x1xf32>
    %11 = vector.broadcast %10 : vector<8x1xf32> to vector<8x8xf32>
    %12 = arith.subf %8, %11 : vector<8x8xf32>
    %13 = math.exp %12 : vector<8x8xf32>
    %cst_10 = arith.constant dense<0.000000e+00> : vector<8xf32>
    %14 = vector.multi_reduction <add>, %13, %cst_10 [1] : vector<8x8xf32> to vector<8xf32>
    %15 = vector.shape_cast %14 : vector<8xf32> to vector<8x1xf32>
    %16 = vector.broadcast %15 : vector<8x1xf32> to vector<8x8xf32>
    %17 = arith.divf %13, %16 : vector<8x8xf32>
    %cst_11 = arith.constant dense<0.000000e+00> : vector<8x8xf32>
    %18 = tpu.matmul %17, %5, %cst_11 {dimension_numbers = #tpu.dot_dimension_numbers<[1], [0], [0], [1], [0, 0, 1, 1], [], []>} : vector<8x8xf32>, vector<8x8xf32>, vector<8x8xf32> -> vector<8x8xf32>
    %c0_12 = arith.constant 0 : index
    %c0_13 = arith.constant 0 : index
    %c0_14 = arith.constant 0 : index
    %19 = vector.load %arg4[%c0_12, %c0_13, %c0_14] : memref<1x8x8xf32, #tpu.memory_space<vmem>>, vector<1x8x8xf32>
    %20 = vector.shape_cast %19 : vector<1x8x8xf32> to vector<8x8xf32>
    %21 = vector.shape_cast %18 : vector<8x8xf32> to vector<1x8x8xf32>
    tpu.vector_store %arg4[%c0_12, %c0_13, %c0_14], %21 {strides = array<i32>} : memref<1x8x8xf32, #tpu.memory_space<vmem>>, vector<1x8x8xf32>,
    return
  }
  func.func @transform_0(%arg0: i32) -> (i32, i32, i32) {
    %c0_i32 = arith.constant 0 : i32
    %c0_i32_0 = arith.constant 0 : i32
    %c0_i32_1 = arith.constant 0 : i32
    return %arg0, %c0_i32, %c0_i32_0 : i32, i32, i32
  }
  func.func @transform_1(%arg0: i32) -> (i32, i32, i32) {
    %c0_i32 = arith.constant 0 : i32
    %c0_i32_0 = arith.constant 0 : i32
    %c0_i32_1 = arith.constant 0 : i32
    return %arg0, %c0_i32, %c0_i32_0 : i32, i32, i32
  }
  func.func @transform_2(%arg0: i32) -> (i32, i32, i32) {
    %c0_i32 = arith.constant 0 : i32
    %c0_i32_0 = arith.constant 0 : i32
    %c0_i32_1 = arith.constant 0 : i32
    return %arg0, %c0_i32, %c0_i32_0 : i32, i32, i32
  }
  func.func @transform_3(%arg0: i32) -> (i32, i32, i32) {
    %c0_i32 = arith.constant 0 : i32
    %c0_i32_0 = arith.constant 0 : i32
    %c0_i32_1 = arith.constant 0 : i32
    return %arg0, %c0_i32, %c0_i32_0 : i32, i32, i32
  }
}

module attributes {stable_mosaic.version = 11 : i64} {
  func.func @_linear_residual_kernel(%arg0: i32, %arg1: memref<16x32xf32, #tpu.memory_space<vmem>>, %arg2: memref<32x32xf32, #tpu.memory_space<vmem>>, %arg3: memref<1x32xf32, #tpu.memory_space<vmem>>, %arg4: memref<16x32xf32, #tpu.memory_space<vmem>>, %arg5: memref<16x32xf32, #tpu.memory_space<vmem>>) attributes {dimension_semantics = [#tpu.dimension_semantics<parallel>], iteration_bounds = array<i64: 1>, scalar_prefetch = 0 : i64, scratch_operands = 0 : i64, tpu.core_type = #tpu.core_type<tc>, window_params = [{transform_indices = @transform_0, window_bounds = array<i64: 16, 32>}, {pipeline_mode = #tpu.pipeline_mode<synchronous>, transform_indices = @transform_1, window_bounds = array<i64: 32, 32>}, {pipeline_mode = #tpu.pipeline_mode<synchronous>, transform_indices = @transform_2, window_bounds = array<i64: 1, 32>}, {transform_indices = @transform_3, window_bounds = array<i64: 16, 32>}, {transform_indices = @transform_4, window_bounds = array<i64: 16, 32>}]} {
    %c0 = arith.constant 0 : index
    %c0_0 = arith.constant 0 : index
    %0 = vector.load %arg1[%c0, %c0_0] : memref<16x32xf32, #tpu.memory_space<vmem>>, vector<16x32xf32>
    %c0_1 = arith.constant 0 : index
    %c0_2 = arith.constant 0 : index
    %1 = vector.load %arg2[%c0_1, %c0_2] : memref<32x32xf32, #tpu.memory_space<vmem>>, vector<32x32xf32>
    %cst = arith.constant dense<0.000000e+00> : vector<16x32xf32>
    %2 = tpu.matmul %0, %1, %cst {dimension_numbers = #tpu.dot_dimension_numbers<[1], [0], [0], [1], [0, 0, 1, 1], [], []>} : vector<16x32xf32>, vector<32x32xf32>, vector<16x32xf32> -> vector<16x32xf32>
    %c0_3 = arith.constant 0 : index
    %c0_4 = arith.constant 0 : index
    %3 = vector.load %arg3[%c0_3, %c0_4] : memref<1x32xf32, #tpu.memory_space<vmem>>, vector<1x32xf32>
    %4 = vector.broadcast %3 : vector<1x32xf32> to vector<16x32xf32>
    %5 = arith.addf %2, %4 : vector<16x32xf32>
    %c0_5 = arith.constant 0 : index
    %c0_6 = arith.constant 0 : index
    %6 = vector.load %arg4[%c0_5, %c0_6] : memref<16x32xf32, #tpu.memory_space<vmem>>, vector<16x32xf32>
    %7 = arith.addf %5, %6 : vector<16x32xf32>
    %c0_7 = arith.constant 0 : index
    %c0_8 = arith.constant 0 : index
    %8 = vector.load %arg5[%c0_7, %c0_8] : memref<16x32xf32, #tpu.memory_space<vmem>>, vector<16x32xf32>
    tpu.vector_store %arg5[%c0_7, %c0_8], %7 {strides = array<i32>} : memref<16x32xf32, #tpu.memory_space<vmem>>, vector<16x32xf32>,
    return
  }
  func.func @transform_0(%arg0: i32) -> (i32, i32) {
    %c0_i32 = arith.constant 0 : i32
    %c0_i32_0 = arith.constant 0 : i32
    return %arg0, %c0_i32 : i32, i32
  }
  func.func @transform_1(%arg0: i32) -> (i32, i32) {
    %c0_i32 = arith.constant 0 : i32
    %c0_i32_0 = arith.constant 0 : i32
    %c0_i32_1 = arith.constant 0 : i32
    return %c0_i32, %c0_i32_0 : i32, i32
  }
  func.func @transform_2(%arg0: i32) -> (i32, i32) {
    %c0_i32 = arith.constant 0 : i32
    %c0_i32_0 = arith.constant 0 : i32
    %c0_i32_1 = arith.constant 0 : i32
    return %c0_i32, %c0_i32_0 : i32, i32
  }
  func.func @transform_3(%arg0: i32) -> (i32, i32) {
    %c0_i32 = arith.constant 0 : i32
    %c0_i32_0 = arith.constant 0 : i32
    return %arg0, %c0_i32 : i32, i32
  }
  func.func @transform_4(%arg0: i32) -> (i32, i32) {
    %c0_i32 = arith.constant 0 : i32
    %c0_i32_0 = arith.constant 0 : i32
    return %arg0, %c0_i32 : i32, i32
  }
}

module attributes {stable_mosaic.version = 11 : i64} {
  func.func @_linear_kernel(%arg0: i32, %arg1: memref<32x32xf32, #tpu.memory_space<vmem>>, %arg2: memref<32x32xf32, #tpu.memory_space<vmem>>, %arg3: memref<1x32xf32, #tpu.memory_space<vmem>>, %arg4: memref<32x32xf32, #tpu.memory_space<vmem>>) attributes {dimension_semantics = [#tpu.dimension_semantics<parallel>], iteration_bounds = array<i64: 1>, scalar_prefetch = 0 : i64, scratch_operands = 0 : i64, tpu.core_type = #tpu.core_type<tc>, window_params = [{transform_indices = @transform_0, window_bounds = array<i64: 32, 32>}, {pipeline_mode = #tpu.pipeline_mode<synchronous>, transform_indices = @transform_1, window_bounds = array<i64: 32, 32>}, {pipeline_mode = #tpu.pipeline_mode<synchronous>, transform_indices = @transform_2, window_bounds = array<i64: 1, 32>}, {transform_indices = @transform_3, window_bounds = array<i64: 32, 32>}]} {
    %c0 = arith.constant 0 : index
    %c0_0 = arith.constant 0 : index
    %0 = vector.load %arg1[%c0, %c0_0] : memref<32x32xf32, #tpu.memory_space<vmem>>, vector<32x32xf32>
    %c0_1 = arith.constant 0 : index
    %c0_2 = arith.constant 0 : index
    %1 = vector.load %arg2[%c0_1, %c0_2] : memref<32x32xf32, #tpu.memory_space<vmem>>, vector<32x32xf32>
    %cst = arith.constant dense<0.000000e+00> : vector<32x32xf32>
    %2 = tpu.matmul %0, %1, %cst {dimension_numbers = #tpu.dot_dimension_numbers<[1], [0], [0], [1], [0, 0, 1, 1], [], []>} : vector<32x32xf32>, vector<32x32xf32>, vector<32x32xf32> -> vector<32x32xf32>
    %c0_3 = arith.constant 0 : index
    %c0_4 = arith.constant 0 : index
    %3 = vector.load %arg3[%c0_3, %c0_4] : memref<1x32xf32, #tpu.memory_space<vmem>>, vector<1x32xf32>
    %4 = vector.broadcast %3 : vector<1x32xf32> to vector<32x32xf32>
    %5 = arith.addf %2, %4 : vector<32x32xf32>
    %c0_5 = arith.constant 0 : index
    %c0_6 = arith.constant 0 : index
    %6 = vector.load %arg4[%c0_5, %c0_6] : memref<32x32xf32, #tpu.memory_space<vmem>>, vector<32x32xf32>
    tpu.vector_store %arg4[%c0_5, %c0_6], %5 {strides = array<i32>} : memref<32x32xf32, #tpu.memory_space<vmem>>, vector<32x32xf32>,
    return
  }
  func.func @transform_0(%arg0: i32) -> (i32, i32) {
    %c0_i32 = arith.constant 0 : i32
    %c0_i32_0 = arith.constant 0 : i32
    return %arg0, %c0_i32 : i32, i32
  }
  func.func @transform_1(%arg0: i32) -> (i32, i32) {
    %c0_i32 = arith.constant 0 : i32
    %c0_i32_0 = arith.constant 0 : i32
    %c0_i32_1 = arith.constant 0 : i32
    return %c0_i32, %c0_i32_0 : i32, i32
  }
  func.func @transform_2(%arg0: i32) -> (i32, i32) {
    %c0_i32 = arith.constant 0 : i32
    %c0_i32_0 = arith.constant 0 : i32
    %c0_i32_1 = arith.constant 0 : i32
    return %c0_i32, %c0_i32_0 : i32, i32
  }
  func.func @transform_3(%arg0: i32) -> (i32, i32) {
    %c0_i32 = arith.constant 0 : i32
    %c0_i32_0 = arith.constant 0 : i32
    return %arg0, %c0_i32 : i32, i32
  }
}

module attributes {stable_mosaic.version = 11 : i64} {
  func.func @_attention_kernel(%arg0: i32, %arg1: memref<1x8x8xf32, #tpu.memory_space<vmem>>, %arg2: memref<1x16x8xf32, #tpu.memory_space<vmem>>, %arg3: memref<1x16x8xf32, #tpu.memory_space<vmem>>, %arg4: memref<1x8x8xf32, #tpu.memory_space<vmem>>) attributes {dimension_semantics = [#tpu.dimension_semantics<parallel>], iteration_bounds = array<i64: 8>, scalar_prefetch = 0 : i64, scratch_operands = 0 : i64, tpu.core_type = #tpu.core_type<tc>, window_params = [{transform_indices = @transform_0, window_bounds = array<i64: 1, 8, 8>}, {transform_indices = @transform_1, window_bounds = array<i64: 1, 16, 8>}, {transform_indices = @transform_2, window_bounds = array<i64: 1, 16, 8>}, {transform_indices = @transform_3, window_bounds = array<i64: 1, 8, 8>}]} {
    %c0 = arith.constant 0 : index
    %c0_0 = arith.constant 0 : index
    %c0_1 = arith.constant 0 : index
    %0 = vector.load %arg1[%c0, %c0_0, %c0_1] : memref<1x8x8xf32, #tpu.memory_space<vmem>>, vector<1x8x8xf32>
    %1 = vector.shape_cast %0 : vector<1x8x8xf32> to vector<8x8xf32>
    %c0_2 = arith.constant 0 : index
    %c0_3 = arith.constant 0 : index
    %c0_4 = arith.constant 0 : index
    %2 = vector.load %arg2[%c0_2, %c0_3, %c0_4] : memref<1x16x8xf32, #tpu.memory_space<vmem>>, vector<1x16x8xf32>
    %3 = vector.shape_cast %2 : vector<1x16x8xf32> to vector<16x8xf32>
    %c0_5 = arith.constant 0 : index
    %c0_6 = arith.constant 0 : index
    %c0_7 = arith.constant 0 : index
    %4 = vector.load %arg3[%c0_5, %c0_6, %c0_7] : memref<1x16x8xf32, #tpu.memory_space<vmem>>, vector<1x16x8xf32>
    %5 = vector.shape_cast %4 : vector<1x16x8xf32> to vector<16x8xf32>
    %cst = arith.constant dense<0.000000e+00> : vector<8x16xf32>
    %6 = tpu.matmul %1, %3, %cst {dimension_numbers = #tpu.dot_dimension_numbers<[1], [1], [0], [0], [0, 0, 1, 0], [], []>} : vector<8x8xf32>, vector<16x8xf32>, vector<8x16xf32> -> vector<8x16xf32>
    %cst_8 = arith.constant 0.353553385 : f32
    %7 = vector.broadcast %cst_8 : f32 to vector<8x16xf32>
    %8 = arith.mulf %6, %7 : vector<8x16xf32>
    %cst_9 = arith.constant dense<0xFF800000> : vector<8xf32>
    %9 = vector.multi_reduction <maximumf>, %8, %cst_9 [1] : vector<8x16xf32> to vector<8xf32>
    %10 = vector.shape_cast %9 : vector<8xf32> to vector<8x1xf32>
    %11 = vector.broadcast %10 : vector<8x1xf32> to vector<8x16xf32>
    %12 = arith.subf %8, %11 : vector<8x16xf32>
    %13 = math.exp %12 : vector<8x16xf32>
    %cst_10 = arith.constant dense<0.000000e+00> : vector<8xf32>
    %14 = vector.multi_reduction <add>, %13, %cst_10 [1] : vector<8x16xf32> to vector<8xf32>
    %15 = vector.shape_cast %14 : vector<8xf32> to vector<8x1xf32>
    %16 = vector.broadcast %15 : vector<8x1xf32> to vector<8x16xf32>
    %17 = arith.divf %13, %16 : vector<8x16xf32>
    %cst_11 = arith.constant dense<0.000000e+00> : vector<8x8xf32>
    %18 = tpu.matmul %17, %5, %cst_11 {dimension_numbers = #tpu.dot_dimension_numbers<[1], [0], [0], [1], [0, 0, 1, 1], [], []>} : vector<8x16xf32>, vector<16x8xf32>, vector<8x8xf32> -> vector<8x8xf32>
    %c0_12 = arith.constant 0 : index
    %c0_13 = arith.constant 0 : index
    %c0_14 = arith.constant 0 : index
    %19 = vector.load %arg4[%c0_12, %c0_13, %c0_14] : memref<1x8x8xf32, #tpu.memory_space<vmem>>, vector<1x8x8xf32>
    %20 = vector.shape_cast %19 : vector<1x8x8xf32> to vector<8x8xf32>
    %21 = vector.shape_cast %18 : vector<8x8xf32> to vector<1x8x8xf32>
    tpu.vector_store %arg4[%c0_12, %c0_13, %c0_14], %21 {strides = array<i32>} : memref<1x8x8xf32, #tpu.memory_space<vmem>>, vector<1x8x8xf32>,
    return
  }
  func.func @transform_0(%arg0: i32) -> (i32, i32, i32) {
    %c0_i32 = arith.constant 0 : i32
    %c0_i32_0 = arith.constant 0 : i32
    %c0_i32_1 = arith.constant 0 : i32
    return %arg0, %c0_i32, %c0_i32_0 : i32, i32, i32
  }
  func.func @transform_1(%arg0: i32) -> (i32, i32, i32) {
    %c0_i32 = arith.constant 0 : i32
    %c0_i32_0 = arith.constant 0 : i32
    %c0_i32_1 = arith.constant 0 : i32
    return %arg0, %c0_i32, %c0_i32_0 : i32, i32, i32
  }
  func.func @transform_2(%arg0: i32) -> (i32, i32, i32) {
    %c0_i32 = arith.constant 0 : i32
    %c0_i32_0 = arith.constant 0 : i32
    %c0_i32_1 = arith.constant 0 : i32
    return %arg0, %c0_i32, %c0_i32_0 : i32, i32, i32
  }
  func.func @transform_3(%arg0: i32) -> (i32, i32, i32) {
    %c0_i32 = arith.constant 0 : i32
    %c0_i32_0 = arith.constant 0 : i32
    %c0_i32_1 = arith.constant 0 : i32
    return %arg0, %c0_i32, %c0_i32_0 : i32, i32, i32
  }
}

module attributes {stable_mosaic.version = 11 : i64} {
  func.func @_ffn_residual_kernel(%arg0: i32, %arg1: memref<16x32xf32, #tpu.memory_space<vmem>>, %arg2: memref<32x64xf32, #tpu.memory_space<vmem>>, %arg3: memref<1x64xf32, #tpu.memory_space<vmem>>, %arg4: memref<64x32xf32, #tpu.memory_space<vmem>>, %arg5: memref<1x32xf32, #tpu.memory_space<vmem>>, %arg6: memref<16x32xf32, #tpu.memory_space<vmem>>, %arg7: memref<16x32xf32, #tpu.memory_space<vmem>>) attributes {dimension_semantics = [#tpu.dimension_semantics<parallel>], iteration_bounds = array<i64: 1>, scalar_prefetch = 0 : i64, scratch_operands = 0 : i64, tpu.core_type = #tpu.core_type<tc>, window_params = [{transform_indices = @transform_0, window_bounds = array<i64: 16, 32>}, {pipeline_mode = #tpu.pipeline_mode<synchronous>, transform_indices = @transform_1, window_bounds = array<i64: 32, 64>}, {pipeline_mode = #tpu.pipeline_mode<synchronous>, transform_indices = @transform_2, window_bounds = array<i64: 1, 64>}, {pipeline_mode = #tpu.pipeline_mode<synchronous>, transform_indices = @transform_3, window_bounds = array<i64: 64, 32>}, {pipeline_mode = #tpu.pipeline_mode<synchronous>, transform_indices = @transform_4, window_bounds = array<i64: 1, 32>}, {transform_indices = @transform_5, window_bounds = array<i64: 16, 32>}, {transform_indices = @transform_6, window_bounds = array<i64: 16, 32>}]} {
    %c0 = arith.constant 0 : index
    %c0_0 = arith.constant 0 : index
    %0 = vector.load %arg1[%c0, %c0_0] : memref<16x32xf32, #tpu.memory_space<vmem>>, vector<16x32xf32>
    %c0_1 = arith.constant 0 : index
    %c0_2 = arith.constant 0 : index
    %1 = vector.load %arg2[%c0_1, %c0_2] : memref<32x64xf32, #tpu.memory_space<vmem>>, vector<32x64xf32>
    %cst = arith.constant dense<0.000000e+00> : vector<16x64xf32>
    %2 = tpu.matmul %0, %1, %cst {dimension_numbers = #tpu.dot_dimension_numbers<[1], [0], [0], [1], [0, 0, 1, 1], [], []>} : vector<16x32xf32>, vector<32x64xf32>, vector<16x64xf32> -> vector<16x64xf32>
    %c0_3 = arith.constant 0 : index
    %c0_4 = arith.constant 0 : index
    %3 = vector.load %arg3[%c0_3, %c0_4] : memref<1x64xf32, #tpu.memory_space<vmem>>, vector<1x64xf32>
    %4 = vector.broadcast %3 : vector<1x64xf32> to vector<16x64xf32>
    %5 = arith.addf %2, %4 : vector<16x64xf32>
    %cst_5 = arith.constant 0.000000e+00 : f32
    %6 = vector.broadcast %cst_5 : f32 to vector<16x64xf32>
    %7 = arith.maximumf %5, %6 : vector<16x64xf32>
    %c0_6 = arith.constant 0 : index
    %c0_7 = arith.constant 0 : index
    %8 = vector.load %arg4[%c0_6, %c0_7] : memref<64x32xf32, #tpu.memory_space<vmem>>, vector<64x32xf32>
    %cst_8 = arith.constant dense<0.000000e+00> : vector<16x32xf32>
    %9 = tpu.matmul %7, %8, %cst_8 {dimension_numbers = #tpu.dot_dimension_numbers<[1], [0], [0], [1], [0, 0, 1, 1], [], []>} : vector<16x64xf32>, vector<64x32xf32>, vector<16x32xf32> -> vector<16x32xf32>
    %c0_9 = arith.constant 0 : index
    %c0_10 = arith.constant 0 : index
    %10 = vector.load %arg5[%c0_9, %c0_10] : memref<1x32xf32, #tpu.memory_space<vmem>>, vector<1x32xf32>
    %11 = vector.broadcast %10 : vector<1x32xf32> to vector<16x32xf32>
    %12 = arith.addf %9, %11 : vector<16x32xf32>
    %c0_11 = arith.constant 0 : index
    %c0_12 = arith.constant 0 : index
    %13 = vector.load %arg6[%c0_11, %c0_12] : memref<16x32xf32, #tpu.memory_space<vmem>>, vector<16x32xf32>
    %14 = arith.addf %12, %13 : vector<16x32xf32>
    %c0_13 = arith.constant 0 : index
    %c0_14 = arith.constant 0 : index
    %15 = vector.load %arg7[%c0_13, %c0_14] : memref<16x32xf32, #tpu.memory_space<vmem>>, vector<16x32xf32>
    tpu.vector_store %arg7[%c0_13, %c0_14], %14 {strides = array<i32>} : memref<16x32xf32, #tpu.memory_space<vmem>>, vector<16x32xf32>,
    return
  }
  func.func @transform_0(%arg0: i32) -> (i32, i32) {
    %c0_i32 = arith.constant 0 : i32
    %c0_i32_0 = arith.constant 0 : i32
    return %arg0, %c0_i32 : i32, i32
  }
  func.func @transform_1(%arg0: i32) -> (i32, i32) {
    %c0_i32 = arith.constant 0 : i32
    %c0_i32_0 = arith.constant 0 : i32
    %c0_i32_1 = arith.constant 0 : i32
    return %c0_i32, %c0_i32_0 : i32, i32
  }
  func.func @transform_2(%arg0: i32) -> (i32, i32) {
    %c0_i32 = arith.constant 0 : i32
    %c0_i32_0 = arith.constant 0 : i32
    %c0_i32_1 = arith.constant 0 : i32
    return %c0_i32, %c0_i32_0 : i32, i32
  }
  func.func @transform_3(%arg0: i32) -> (i32, i32) {
    %c0_i32 = arith.constant 0 : i32
    %c0_i32_0 = arith.constant 0 : i32
    %c0_i32_1 = arith.constant 0 : i32
    return %c0_i32, %c0_i32_0 : i32, i32
  }
  func.func @transform_4(%arg0: i32) -> (i32, i32) {
    %c0_i32 = arith.constant 0 : i32
    %c0_i32_0 = arith.constant 0 : i32
    %c0_i32_1 = arith.constant 0 : i32
    return %c0_i32, %c0_i32_0 : i32, i32
  }
  func.func @transform_5(%arg0: i32) -> (i32, i32) {
    %c0_i32 = arith.constant 0 : i32
    %c0_i32_0 = arith.constant 0 : i32
    return %arg0, %c0_i32 : i32, i32
  }
  func.func @transform_6(%arg0: i32) -> (i32, i32) {
    %c0_i32 = arith.constant 0 : i32
    %c0_i32_0 = arith.constant 0 : i32
    return %arg0, %c0_i32 : i32, i32
  }
}

</mosaic_0001>

<bundles_post_ra>
// kernel: encoder_layer_forward.19
= control target key start
LH: loop header
LB: loop body
LE: loop exit
PB: predicated region body
PF: predicated region fallthrough
CT: control target
= control target key end

     0   :  { %vm16_vm0 = vcmask 261120   ;;  %s137_s0 = inlined_call_operand.vmem [shape: f32[16,32], index: 0, kind: input, shape index: {}]   ;;  %s138_s1 = inlined_call_operand.vmem [shape: f32[1,32], index: 1, kind: input, shape index: {}]   ;;  %s139_s2 = inlined_call_operand.vmem [shape: f32[1,32], index: 2, kind: input, shape index: {}]   ;;  %s140_s3 = inlined_call_operand.vmem [shape: f32[16,32], index: 3, kind: output, shape index: {}]  }
   0x1   :  { %v14_v0 = vld [vmem:[%s137_s0] sm:$0xff]  ;;  %v15_v1 = vld [vmem:[%s137_s0 + $0x8] sm:$0xff] }
   0x2   :  { %v17_v2 = vsel %vm16_vm0, %v14_v0, 0.0  ;;  %v20_v3 = vsel %vm16_vm0, %v15_v1, 0.0  ;;  %v83_v30 = vld [vmem:[%s138_s1] ss:$0 sm:$0xff] }
   0x3   :  { %18 = vadd.xlane.f32.xlu0 %v17_v2  ;;  %v84_v33 = vld [vmem:[%s139_s2] ss:$0 sm:$0xff] }
   0x7   :  { %21 = vadd.xlane.f32.xlu0 %v20_v3 }
  0x90   :  { %v19_v4 = vpop.xlane.xlu0 %18 }
  0x91   :  { %v24_v5 = vmul.f32 0.03125, %v19_v4 }
  0x93   :  { %v26_v6 = vsub.f32 %v14_v0, %v24_v5 }
  0x94   :  { %v22_v7 = vpop.xlane.xlu0 %21 }
  0x95   :  { %v25_v8 = vmul.f32 0.03125, %v22_v7  ;;  %v28_v9 = vmul.f32 %v26_v6, %v26_v6  ;;  %v60_v31 = vmul.f32 %v83_v30, %v26_v6 }
  0x97   :  { %v27_v10 = vsub.f32 %v15_v1, %v25_v8  ;;  %v30_v11 = vsel %vm16_vm0, %v28_v9, 0.0 }
  0x98   :  { %31 = vadd.xlane.f32.xlu1 %v30_v11 }
  0x99   :  { %v29_v12 = vmul.f32 %v27_v10, %v27_v10  ;;  %v61_v35 = vmul.f32 %v83_v30, %v27_v10 }
  0x9b   :  { %v33_v13 = vsel %vm16_vm0, %v29_v12, 0.0 }
  0x9c   :  { %34 = vadd.xlane.f32.xlu1 %v33_v13 }
 0x125   :  { %v32_v14 = vpop.xlane.xlu1 %31 }
 0x126   :  { %v37_v15 = vmul.f32 0.032258064, %v32_v14 }
 0x128   :  { %85 = vrsqrt.f32 %v37_v15  ;;  %vm41_vm1 = vcmp.eq.f32.partialorder %v37_v15, inf  ;;  %v44_v20 = vand.u32 2147483648, %v37_v15  ;;  %vm43_vm2 = vcmp.eq.f32.partialorder %v37_v15, 0.0 }
 0x129   :  { %v35_v16 = vpop.xlane.xlu1 %34 }
 0x12a   :  { %v38_v17 = vmul.f32 0.032258064, %v35_v16 }
 0x12c   :  { %87 = vrsqrt.f32 %v38_v17  ;;  %vm48_vm3 = vcmp.eq.f32.partialorder %v38_v17, inf  ;;  %v51_v26 = vand.u32 2147483648, %v38_v17  ;;  %vm50_vm4 = vcmp.eq.f32.partialorder %v38_v17, 0.0 }
 0x132   :  { %v86_v18 = vpop.eup %85 }
 0x133   :  { %v40_v19 = vmul.f32 %v86_v18, %v37_v15 }
 0x135   :  { %v42_v21 = vsel %vm41_vm1, %v37_v15, %v40_v19 }
 0x136   :  { %v88_v22 = vpop.eup %87  ;;  %v45_v23 = vsel %vm43_vm2, %v44_v20, %v42_v21 }
 0x137   :  { %v62_v24 = vadd.f32 1e-06, %v45_v23  ;;  %v47_v25 = vmul.f32 %v88_v22, %v38_v17 }
 0x139   :  { %89 = vrcp.f32 %v62_v24  ;;  %v49_v27 = vsel %vm48_vm3, %v38_v17, %v47_v25 }
 0x13a   :  { %v52_v28 = vsel %vm50_vm4, %v51_v26, %v49_v27 }
 0x13b   :  { %v63_v29 = vadd.f32 1e-06, %v52_v28 }
 0x13d   :  { %91 = vrcp.f32 %v63_v29 }
 0x143   :  { %v90_v32 = vpop.eup %89 }
 0x144   :  { %v65_v34 = vmul.f32 %v90_v32, %v60_v31 }
 0x146   :  { %v75_v36 = vadd.f32 %v84_v33, %v65_v34 }
 0x147   :  { %v92_v37 = vpop.eup %91 }
 0x148   :  { %77 = vst.msk [vmem:[%s140_s3] sm:$0xff] %vm16_vm0, %v75_v36  ;;  %v67_v38 = vmul.f32 %v92_v37, %v61_v35 }
 0x14a   :  { %v76_v39 = vadd.f32 %v84_v33, %v67_v38 }
 0x14c   :  { %78 = vst.msk [vmem:[%s140_s3 + $0x8] sm:$0xff] %vm16_vm0, %v76_v39 }

// kernel: encoder_layer_forward.21
= control target key start
LH: loop header
LB: loop body
LE: loop exit
PB: predicated region body
PF: predicated region fallthrough
CT: control target
= control target key end

     0   :  { %vm27_vm0 = vcmask 261120   ;;  %s194_s1 = inlined_call_operand.vmem [shape: f32[32,32], index: 1, kind: input, shape index: {}]   ;;  %s195_s0 = inlined_call_operand.vmem [shape: f32[16,32], index: 0, kind: input, shape index: {}]   ;;  %s196_s2 = inlined_call_operand.vmem [shape: f32[1,32], index: 2, kind: input, shape index: {}]   ;;  %s197_s3 = inlined_call_operand.vmem [shape: f32[16,32], index: 3, kind: output, shape index: {}]  }
   0x1   :  { %v16_v0 = vld [vmem:[%s194_s1] sm:$0xff]  ;;  %v17_v1 = vld [vmem:[%s194_s1 + $0x8] sm:$0xff]  ;;  %v18_v2 = vld [vmem:[%s194_s1 + $0x10] sm:$0xff] }
   0x2   :  { %v135_v3 = vpack.c.bf16 %v17_v1, %v16_v0  ;;  %v19_v4 = vld [vmem:[%s194_s1 + $0x18] sm:$0xff]  ;;  %v14_v5 = vld [vmem:[%s195_s0] sm:$0xff]  ;;  %v15_v7 = vld [vmem:[%s195_s0 + $0x8] sm:$0xff] }
   0x3   :  { %v139_v6 = vpack.c.bf16 %v19_v4, %v18_v2  ;;  %132 = vmatprep.mubr.msk.f32.mxu0 %vm27_vm0, %v14_v5  ;;  %v115_v8 = vld [vmem:[%s196_s2] ss:$0 sm:$0xff] }
   0x4   :  { %136 = vmatprep.subr.bf16.mxu0 %v135_v3 }
   0x5   :  { %138 = vmatpush3.bf16.msra.mxu0 %v135_v3 }
   0x6   :  { %140 = vmatprep.subr.bf16.mxu0 %v139_v6 }
   0x9   :  { %142 = vmatpush3.bf16.msra.mxu0 %v139_v6 }
   0xc   :  { %133 = vmatmul.mubr.msk.f32.vlgmr.msra.gmra.mrb[0].mxu0 %vm27_vm0, %v15_v7 }
  0xdf   :  { %v134_v9 = vpop.f32.mrb[0].mxu0 }
  0xe0   :  { %v106_v10 = vadd.f32 %v134_v9, %v115_v8  ;;  %v100_v11 = vpop.f32.mrb[1].mxu0 }
  0xe1   :  { %v101_v12 = vadd.f32 %v115_v8, %v100_v11 }
  0xe2   :  { %110 = vst.msk [vmem:[%s197_s3 + $0x8] sm:$0xff] %vm27_vm0, %v106_v10 }
  0xe3   :  { %109 = vst.msk [vmem:[%s197_s3] sm:$0xff] %vm27_vm0, %v101_v12 }

// kernel: encoder_layer_forward.23
= control target key start
LH: loop header
LB: loop body
LE: loop exit
PB: predicated region body
PF: predicated region fallthrough
CT: control target
= control target key end

     0   :  { %s515_s12 = smov 0   ;;  %s550_s0 = inlined_call_operand.vmem [shape: f32[8,8,8], index: 0, kind: input, shape index: {}]   ;;  %s551_s1 = inlined_call_operand.vmem [shape: f32[8,8,8], index: 1, kind: input, shape index: {}]   ;;  %s552_s2 = inlined_call_operand.vmem [shape: f32[8,8,8], index: 2, kind: input, shape index: {}]   ;;  %s553_s3 = inlined_call_operand.vmem [shape: f32[8,8,8], index: 3, kind: output, shape index: {}]  }
   0x1 LB: > { %s443_s13 = sadd.s32 4294967295, %s491_s12   ;;  %p447_p0 = scmp.ge.s32.totalorder %s491_s12, 1  ;;  %s491_s12 = sphi %s515_s12, %s13_s12  }
   0x2   : > { %p154_p1 = scmp.lt.s32.totalorder %s491_s12, 9 }
   0x4   : > { %p155_p2 = pnand %p447_p0, %p154_p1 }
   0x5   : > { %p184_p3 = scmp.lt.s32.totalorder (!%p155_p2), %s443_s13, 7  ;;  %v493_v0 = vmov (!%p155_p2), 0.0   ;;  %vm494_vm0 = vmmov (!%p155_p2), 0   ;;  %vm203_vm1 = vcmask (!%p155_p2), 64512  }
   0x6   : > { %158 = sbr.rel (%p155_p2) target bundleno = 761 (0x2f9), region = 32  ;;  %461 = vmatprep.subr.mxu0 (!%p155_p2), %v493_v0  ;;  %463 = vmatprep.mubr.msk.f32.mxu0 (!%p155_p2), %vm494_vm0, %v493_v0 }
   0x7   : > { %466 = vmatprep.subr.mxu1 (!%p155_p2), %v493_v0  ;;  %468 = vmatprep.mubr.msk.f32.mxu1 (!%p155_p2), %vm494_vm0, %v493_v0 }
   0xd   : > { %s555_s13 = smov (!%p184_p3, %s443_s13), 7 }
   0xe   : > { %s523_s14 = sshll.u32 %s555_s13, 3 }
   0xf   : > { %s191_s17 = scalar_lea.vmem %s551_s1, %s523_s14  ;;  %s187_s20 = scalar_lea.vmem %s550_s0, %s523_s14 }
  0x10   : > { %v201_v1 = vld [vmem:[%s191_s17] sm:$0xff]  ;;  %s195_s23 = scalar_lea.vmem %s552_s2, %s523_s14  ;;  %s199_s26 = scalar_lea.vmem %s553_s3, %s523_s14 }
  0x11   : > { %462 = vmatpush3.xpose.msk.msra.mxu0 %vm203_vm1, %v201_v1  ;;  %v200_v2 = vld [vmem:[%s187_s20] sm:$0xff] }
  0x12   : > { %v202_v12 = vld [vmem:[%s195_s23] sm:$0xff] }
  0x13   : > { %467 = vmatpush3.msra.mxu1 %v202_v12 }
  0x14   : > { %464 = vmatmul.mubr.msk.f32.vlgmr.msra.gmra.mrb[0].mxu0 %vm203_vm1, %v200_v2 }
  0xe7   : > { %v276_v3 = vpop.f32.mrb[0].mxu0 }
  0xe8   : > { %v280_v4 = vmul.f32 0.35355338, %v276_v3  ;;  %v465_v5 = vpop.f32.mrb[1].mxu0 }
  0xea   : > { %v281_v6 = vsel %vm203_vm1, %v280_v4, -inf }
  0xeb   : > { %282 = vmax.xlane.f32.xlu0 %v281_v6 }
 0x178   : > { %v283_v7 = vpop.xlane.xlu0 %282 }
 0x179   : > { %v284_v8 = vsub.f32 %v280_v4, %v283_v7 }
 0x17b   : > { %v285_v9 = vmul.f32 1.442695, %v284_v8 }
 0x17d   : > { %481 = vpow2.f32 %v285_v9 }
 0x187   : > { %v482_v10 = vpop.eup %481 }
 0x188   : > { %v287_v11 = vsel %vm203_vm1, %v482_v10, 0.0 }
 0x189   : > { %288 = vadd.xlane.f32.xlu0 %v287_v11 }
 0x216   : > { %v289_v13 = vpop.xlane.xlu0 %288 }
 0x217   : > { %483 = vrcp.f32 %v289_v13 }
 0x221   : > { %v484_v14 = vpop.eup %483 }
 0x222   : > { %v291_v15 = vmul.f32 %v484_v14, %v482_v10 }
 0x224   : > { %469 = vmatmul.mubr.msk.f32.vlgmr.msra.gmra.mrb[0].mxu1 %vm203_vm1, %v291_v15 }
 0x2f7   : > { %v361_v16 = vpop.f32.mrb[0].mxu1 }
 0x2f8   : > { %365 = vst.msk [vmem:[%s199_s26] sm:$0xff] %vm203_vm1, %v361_v16  ;;  %v470_v17 = vpop.f32.mrb[1].mxu1 }
 0x2f9 PF: > { %s13_s12 = sadd.s32 1, %s491_s12  }
 0x2fa   : > { %p10_p4 = scmp.ge.s32.totalorder %s13_s12, 10  }
 0x2fc   :  { %12 = sbr.rel (!%p10_p4) target bundleno = 1 (0x1), region = 68 }

// kernel: encoder_layer_forward.24
= control target key start
LH: loop header
LB: loop body
LE: loop exit
PB: predicated region body
PF: predicated region fallthrough
CT: control target
= control target key end

     0   :  { %vm30_vm0 = vcmask 261120   ;;  %s212_s1 = inlined_call_operand.vmem [shape: f32[32,32], index: 1, kind: input, shape index: {}]   ;;  %s213_s0 = inlined_call_operand.vmem [shape: f32[16,32], index: 0, kind: input, shape index: {}]   ;;  %s214_s2 = inlined_call_operand.vmem [shape: f32[1,32], index: 2, kind: input, shape index: {}]   ;;  %s215_s3 = inlined_call_operand.vmem [shape: f32[16,32], index: 3, kind: input, shape index: {}]   ;;  %s216_s4 = inlined_call_operand.vmem [shape: f32[16,32], index: 4, kind: output, shape index: {}]  }
   0x1   :  { %v19_v0 = vld [vmem:[%s212_s1] sm:$0xff]  ;;  %v20_v1 = vld [vmem:[%s212_s1 + $0x8] sm:$0xff]  ;;  %v21_v2 = vld [vmem:[%s212_s1 + $0x10] sm:$0xff] }
   0x2   :  { %v142_v3 = vpack.c.bf16 %v20_v1, %v19_v0  ;;  %v22_v4 = vld [vmem:[%s212_s1 + $0x18] sm:$0xff]  ;;  %v17_v5 = vld [vmem:[%s213_s0] sm:$0xff]  ;;  %v18_v7 = vld [vmem:[%s213_s0 + $0x8] sm:$0xff] }
   0x3   :  { %v146_v6 = vpack.c.bf16 %v22_v4, %v21_v2  ;;  %139 = vmatprep.mubr.msk.f32.mxu0 %vm30_vm0, %v17_v5  ;;  %v122_v8 = vld [vmem:[%s214_s2] ss:$0 sm:$0xff]  ;;  %v113_v10 = vld [vmem:[%s215_s3 + $0x8] sm:$0xff] }
   0x4   :  { %143 = vmatprep.subr.bf16.mxu0 %v142_v3  ;;  %v112_v13 = vld [vmem:[%s215_s3] sm:$0xff] }
   0x5   :  { %145 = vmatpush3.bf16.msra.mxu0 %v142_v3 }
   0x6   :  { %147 = vmatprep.subr.bf16.mxu0 %v146_v6 }
   0x9   :  { %149 = vmatpush3.bf16.msra.mxu0 %v146_v6 }
   0xc   :  { %140 = vmatmul.mubr.msk.f32.vlgmr.msra.gmra.mrb[0].mxu0 %vm30_vm0, %v18_v7 }
  0xdf   :  { %v141_v9 = vpop.f32.mrb[0].mxu0 }
  0xe0   :  { %v109_v11 = vadd.f32 %v141_v9, %v122_v8  ;;  %v103_v12 = vpop.f32.mrb[1].mxu0 }
  0xe1   :  { %v104_v14 = vadd.f32 %v122_v8, %v103_v12 }
  0xe2   :  { %v115_v15 = vadd.f32 %v113_v10, %v109_v11 }
  0xe3   :  { %v114_v16 = vadd.f32 %v112_v13, %v104_v14 }
  0xe4   :  { %117 = vst.msk [vmem:[%s216_s4 + $0x8] sm:$0xff] %vm30_vm0, %v115_v15 }
  0xe5   :  { %116 = vst.msk [vmem:[%s216_s4] sm:$0xff] %vm30_vm0, %v114_v16 }

// kernel: encoder_layer_forward.32
= control target key start
LH: loop header
LB: loop body
LE: loop exit
PB: predicated region body
PF: predicated region fallthrough
CT: control target
= control target key end

     0   :  { %vm29_vm0 = vcmask 261120   ;;  %s241_s1 = inlined_call_operand.vmem [shape: f32[32,32], index: 1, kind: input, shape index: {}]   ;;  %s242_s0 = inlined_call_operand.vmem [shape: f32[32,32], index: 0, kind: input, shape index: {}]   ;;  %s243_s2 = inlined_call_operand.vmem [shape: f32[1,32], index: 2, kind: input, shape index: {}]   ;;  %s244_s3 = inlined_call_operand.vmem [shape: f32[32,32], index: 3, kind: output, shape index: {}]  }
   0x1   :  { %v18_v0 = vld [vmem:[%s241_s1] sm:$0xff]  ;;  %v19_v1 = vld [vmem:[%s241_s1 + $0x8] sm:$0xff]  ;;  %v20_v2 = vld [vmem:[%s241_s1 + $0x10] sm:$0xff] }
   0x2   :  { %v162_v3 = vpack.c.bf16 %v19_v1, %v18_v0  ;;  %v21_v4 = vld [vmem:[%s241_s1 + $0x18] sm:$0xff]  ;;  %v14_v5 = vld [vmem:[%s242_s0] sm:$0xff]  ;;  %v16_v6 = vld [vmem:[%s242_s0 + $0x10] sm:$0xff] }
   0x3   :  { %v166_v7 = vpack.c.bf16 %v21_v4, %v20_v2  ;;  %156 = vmatprep.mubr.msk.f32.mxu0 %vm29_vm0, %v14_v5  ;;  %159 = vmatprep.mubr.msk.f32.mxu1 %vm29_vm0, %v16_v6  ;;  %v15_v8 = vld [vmem:[%s242_s0 + $0x8] sm:$0xff]  ;;  %v17_v9 = vld [vmem:[%s242_s0 + $0x18] sm:$0xff]  ;;  %v135_v10 = vld [vmem:[%s243_s2] ss:$0 sm:$0xff] }
   0x4   :  { %163 = vmatprep.subr.bf16.mxu0 %v162_v3  ;;  %170 = vmatprep.subr.bf16.mxu1 %v162_v3 }
   0x5   :  { %165 = vmatpush3.bf16.msra.mxu0 %v162_v3  ;;  %172 = vmatpush3.bf16.msra.mxu1 %v162_v3 }
   0x6   :  { %167 = vmatprep.subr.bf16.mxu0 %v166_v7  ;;  %171 = vmatprep.subr.bf16.mxu1 %v166_v7 }
   0x9   :  { %169 = vmatpush3.bf16.msra.mxu0 %v166_v7  ;;  %173 = vmatpush3.bf16.msra.mxu1 %v166_v7 }
   0xc   :  { %157 = vmatmul.mubr.msk.f32.vlgmr.msra.gmra.mrb[0].mxu0 %vm29_vm0, %v15_v8  ;;  %160 = vmatmul.mubr.msk.f32.vlgmr.msra.gmra.mrb[0].mxu1 %vm29_vm0, %v17_v9 }
  0xdf   :  { %v158_v11 = vpop.f32.mrb[0].mxu0  ;;  %v161_v12 = vpop.f32.mrb[0].mxu1 }
  0xe0   :  { %v114_v13 = vadd.f32 %v158_v11, %v135_v10  ;;  %v124_v14 = vadd.f32 %v161_v12, %v135_v10  ;;  %v108_v15 = vpop.f32.mrb[1].mxu0  ;;  %v118_v16 = vpop.f32.mrb[1].mxu1 }
  0xe1   :  { %v109_v17 = vadd.f32 %v135_v10, %v108_v15  ;;  %v119_v18 = vadd.f32 %v135_v10, %v118_v16 }
  0xe2   :  { %128 = vst.msk [vmem:[%s244_s3 + $0x8] sm:$0xff] %vm29_vm0, %v114_v13  ;;  %130 = vst.msk [vmem:[%s244_s3 + $0x18] sm:$0xff] %vm29_vm0, %v124_v14 }
  0xe3   :  { %127 = vst.msk [vmem:[%s244_s3] sm:$0xff] %vm29_vm0, %v109_v17  ;;  %129 = vst.msk [vmem:[%s244_s3 + $0x10] sm:$0xff] %vm29_vm0, %v119_v18 }

// kernel: encoder_layer_forward.34
= control target key start
LH: loop header
LB: loop body
LE: loop exit
PB: predicated region body
PF: predicated region fallthrough
CT: control target
= control target key end

     0   :  { %s547_s12 = smov 0   ;;  %s581_s0 = inlined_call_operand.vmem [shape: f32[8,8,8], index: 0, kind: input, shape index: {}]   ;;  %s582_s1 = inlined_call_operand.vmem [shape: f32[8,16,8], index: 1, kind: input, shape index: {}]   ;;  %s583_s2 = inlined_call_operand.vmem [shape: f32[8,16,8], index: 2, kind: input, shape index: {}]   ;;  %s584_s3 = inlined_call_operand.vmem [shape: f32[8,8,8], index: 3, kind: output, shape index: {}]  }
   0x1 LB: > { %s455_s13 = sadd.s32 4294967295, %s522_s12   ;;  %p459_p0 = scmp.ge.s32.totalorder %s522_s12, 1  ;;  %s522_s12 = sphi %s547_s12, %s13_s12  }
   0x2   : > { %p156_p1 = scmp.lt.s32.totalorder %s522_s12, 9 }
   0x4   : > { %p157_p2 = pnand %p459_p0, %p156_p1 }
   0x5   : > { %p188_p3 = scmp.lt.s32.totalorder (!%p157_p2), %s455_s13, 7  ;;  %v524_v0 = vmov (!%p157_p2), 0.0|0.0   ;;  %vm525_vm0 = vmmov (!%p157_p2), 0   ;;  %v526_v1 = vmov (!%p157_p2), 0.0   ;;  %vm211_vm1 = vcmask (!%p157_p2), 64512  }
   0x6   : > { %160 = sbr.rel (%p157_p2) target bundleno = 767 (0x2ff), region = 32  ;;  %494 = vmatprep.subr.bf16.mxu0 (!%p157_p2), %v524_v0  ;;  %484 = vmatprep.mubr.msk.f32.mxu0 (!%p157_p2), %vm525_vm0, %v526_v1  ;;  %vm496_vm2 = vmpackc.low (!%p157_p2), %vm211_vm1, %vm211_vm1  ;;  %vm292_vm3 = vcmask (!%p157_p2), 130048  }
   0x7   : > { %498 = vmatprep.subr.bf16.mxu1 (!%p157_p2), %v524_v0  ;;  %491 = vmatprep.mubr.msk.f32.mxu1 (!%p157_p2), %vm525_vm0, %v526_v1 }
   0xd   : > { %s586_s13 = smov (!%p188_p3, %s455_s13), 7 }
   0xe   : > { %s472_s14 = sshll.u32 %s586_s13, 4  ;;  %s460_s18 = sshll.u32 %s586_s13, 3 }
   0xf   : > { %s196_s17 = scalar_lea.vmem %s582_s1, %s472_s14  ;;  %s191_s21 = scalar_lea.vmem %s581_s0, %s460_s18 }
  0x10   : > { %v207_v2 = vld [vmem:[%s196_s17] sm:$0xff]  ;;  %v208_v3 = vld [vmem:[%s196_s17 + $0x8] sm:$0xff]  ;;  %s201_s24 = scalar_lea.vmem %s583_s2, %s472_s14  ;;  %s205_s27 = scalar_lea.vmem %s584_s3, %s460_s18 }
  0x11   : > { %v495_v4 = vpack.c.bf16 %v208_v3, %v207_v2  ;;  %v206_v5 = vld [vmem:[%s191_s21] sm:$0xff]  ;;  %v210_v16 = vld [vmem:[%s201_s24 + $0x8] sm:$0xff] }
  0x12   : > { %v209_v15 = vld [vmem:[%s201_s24] sm:$0xff] }
  0x13   : > { %497 = vmatpush3.bf16.xpose.msk.msra.mxu0 %vm496_vm2, %v495_v4  ;;  %v499_v17 = vpack.c.bf16 %v210_v16, %v209_v15 }
  0x15   : > { %500 = vmatpush3.bf16.msra.mxu1 %v499_v17 }
  0x1a   : > { %485 = vmatmul.mubr.msk.f32.vlgmr.msra.gmra.mrb[0].mxu0 %vm211_vm1, %v206_v5 }
  0xed   : > { %v287_v6 = vpop.f32.mrb[0].mxu0 }
  0xee   : > { %v291_v7 = vmul.f32 0.35355338, %v287_v6  ;;  %v486_v8 = vpop.f32.mrb[1].mxu0 }
  0xf0   : > { %v293_v9 = vsel %vm292_vm3, %v291_v7, -inf }
  0xf1   : > { %294 = vmax.xlane.f32.xlu0 %v293_v9 }
 0x17e   : > { %v295_v10 = vpop.xlane.xlu0 %294 }
 0x17f   : > { %v296_v11 = vsub.f32 %v291_v7, %v295_v10 }
 0x181   : > { %v297_v12 = vmul.f32 1.442695, %v296_v11 }
 0x183   : > { %512 = vpow2.f32 %v297_v12 }
 0x18d   : > { %v513_v13 = vpop.eup %512 }
 0x18e   : > { %v299_v14 = vsel %vm292_vm3, %v513_v13, 0.0 }
 0x18f   : > { %300 = vadd.xlane.f32.xlu0 %v299_v14 }
 0x21c   : > { %v301_v18 = vpop.xlane.xlu0 %300 }
 0x21d   : > { %514 = vrcp.f32 %v301_v18 }
 0x227   : > { %v515_v19 = vpop.eup %514 }
 0x228   : > { %v303_v20 = vmul.f32 %v515_v19, %v513_v13 }
 0x22a   : > { %492 = vmatmul.mubr.msk.f32.vlgmr.msra.gmra.mrb[0].mxu1 %vm292_vm3, %v303_v20 }
 0x2fd   : > { %v373_v21 = vpop.f32.mrb[0].mxu1 }
 0x2fe   : > { %377 = vst.msk [vmem:[%s205_s27] sm:$0xff] %vm211_vm1, %v373_v21  ;;  %v493_v22 = vpop.f32.mrb[1].mxu1 }
 0x2ff PF: > { %s13_s12 = sadd.s32 1, %s522_s12  }
 0x300   : > { %p10_p4 = scmp.ge.s32.totalorder %s13_s12, 10  }
 0x302   :  { %12 = sbr.rel (!%p10_p4) target bundleno = 1 (0x1), region = 68 }

// kernel: encoder_layer_forward.37
= control target key start
LH: loop header
LB: loop body
LE: loop exit
PB: predicated region body
PF: predicated region fallthrough
CT: control target
= control target key end

     0   :  { %vm37_vm0 = vcmask 261120   ;;  %s451_s0 = inlined_call_operand.vmem [shape: f32[16,32], index: 0, kind: input, shape index: {}]   ;;  %s452_s1 = inlined_call_operand.vmem [shape: f32[32,64], index: 1, kind: input, shape index: {}]   ;;  %s453_s2 = inlined_call_operand.vmem [shape: f32[1,64], index: 2, kind: input, shape index: {}]   ;;  %s454_s3 = inlined_call_operand.vmem [shape: f32[64,32], index: 3, kind: input, shape index: {}]   ;;  %s455_s4 = inlined_call_operand.vmem [shape: f32[1,32], index: 4, kind: input, shape index: {}]   ;;  %s456_s5 = inlined_call_operand.vmem [shape: f32[16,32], index: 5, kind: input, shape index: {}]   ;;  %s457_s6 = inlined_call_operand.hbm [shape: f32[16,32], index: 6, kind: output, shape index: {}]  }
   0x1   :  { %v26_v0 = vld [vmem:[%s452_s1] sm:$0xff]  ;;  %v27_v1 = vld [vmem:[%s452_s1 + $0x8] sm:$0xff]  ;;  %v28_v2 = vld [vmem:[%s452_s1 + $0x10] sm:$0xff] }
   0x2   :  { %v292_v3 = vpack.c.bf16 %v27_v1, %v26_v0  ;;  %v29_v4 = vld [vmem:[%s452_s1 + $0x18] sm:$0xff]  ;;  %v24_v5 = vld [vmem:[%s451_s0] sm:$0xff]  ;;  %v122_v8 = vld [vmem:[%s454_s3 + $0x8] sm:$0xff] }
   0x3   :  { %v296_v6 = vpack.c.bf16 %v29_v4, %v28_v2  ;;  %270 = vmatprep.mubr.msk.f32.mxu0 %vm37_vm0, %v24_v5  ;;  %v121_v7 = vld [vmem:[%s454_s3] sm:$0xff]  ;;  %v123_v9 = vld [vmem:[%s454_s3 + $0x10] sm:$0xff]  ;;  %v124_v11 = vld [vmem:[%s454_s3 + $0x18] sm:$0xff] }
   0x4   :  { %293 = vmatprep.subr.bf16.mxu0 %v292_v3  ;;  %v300_v10 = vpack.c.bf16 %v122_v8, %v121_v7  ;;  %v304_v12 = vpack.c.bf16 %v124_v11, %v123_v9  ;;  %v125_v13 = vld [vmem:[%s454_s3 + $0x20] sm:$0xff]  ;;  %v126_v14 = vld [vmem:[%s454_s3 + $0x28] sm:$0xff] }
   0x5   :  { %295 = vmatpush3.bf16.msra.mxu0 %v292_v3 }
   0x6   :  { %11 = vsyncpa [#allocation3], 0  ;;  %297 = vmatprep.subr.bf16.mxu0 %v296_v6  ;;  %301 = vmatprep.subr.bf16.mxu1 %v300_v10  ;;  %v308_v15 = vpack.c.bf16 %v126_v14, %v125_v13  ;;  %v25_v16 = vld [vmem:[%s451_s0 + $0x8] sm:$0xff]  ;;  %v127_v17 = vld [vmem:[%s454_s3 + $0x30] sm:$0xff]  ;;  %vm136_vm1 = vcmask 523264   ;;  %s343_s28 = smov [#allocation2]  }
   0x7   :  { %303 = vmatpush3.bf16.msra.mxu1 %v300_v10  ;;  %v128_v18 = vld [vmem:[%s454_s3 + $0x38] sm:$0xff]  ;;  %v240_v20 = vld [vmem:[%s453_s2] ss:$0 sm:$0xff]  ;;  %v219_v29 = vld [vmem:[%s456_s5 + $0x8] sm:$0xff]  ;;  %s229_s2 = sshll.u32 %s343_s28, 4  ;;  %s230_s2 = int_to_ptr.vmem [resolvable:$true] %s229_s2 }
   0x8   :  { %305 = vmatprep.subr.bf16.mxu1 %v304_v12  ;;  %v312_v19 = vpack.c.bf16 %v128_v18, %v127_v17  ;;  %v243_v27 = vld [vmem:[%s455_s4] ss:$0 sm:$0xff]  ;;  %s319_s4 = scalar_lea.vmem %s230_s2, 256  ;;  %p324_p1 = scmp.lt.s32.totalorder %s230_s2, %s230_s2 }
   0x9   :  { %299 = vmatpush3.bf16.msra.mxu0 %v296_v6  ;;  %v218_v32 = vld [vmem:[%s456_s5] sm:$0xff]  ;;  %p320_p0 = scmp.ne.s32.totalorder %s230_s2, %s319_s4  ;;  %p325_p2 = scmp.lt.s32.totalorder %s319_s4, %s319_s4 }
   0xb   :  { %307 = vmatpush3.bf16.msra.mxu1 %v304_v12  ;;  %p326_p3 = por %p325_p2, %p324_p1 }
   0xc   :  { %271 = vmatmul.mubr.msk.f32.vlgmr.msra.gmra.mrb[0].mxu0 %vm37_vm0, %v25_v16  ;;  %309 = vmatprep.subr.bf16.mxu1 %v308_v15 }
   0xd   :  { %p327_p4 = pnand %p326_p3, %p320_p0 }
   0xf   :  { %311 = vmatpush3.bf16.msra.mxu1 %v308_v15 }
  0x10   :  { %313 = vmatprep.subr.bf16.mxu1 %v312_v19 }
  0x13   :  { %315 = vmatpush3.bf16.msra.mxu1 %v312_v19 }
  0xdf   :  { %v272_v21 = vpop.f32.mrb[0].mxu0 }
  0xe0   :  { %v116_v22 = vadd.f32 %v272_v21, %v240_v20  ;;  %v110_v23 = vpop.f32.mrb[1].mxu0 }
  0xe1   :  { %v111_v24 = vadd.f32 %v240_v20, %v110_v23 }
  0xe2   :  { %v120_v26 = vmax.f32 %v116_v22, 0.0 }
  0xe3   :  { %v119_v25 = vmax.f32 %v111_v24, 0.0 }
  0xe5   :  { %289 = vmatprep.mubr.msk.f32.mxu1 %vm136_vm1, %v119_v25 }
  0xe6   :  { %290 = vmatmul.mubr.msk.f32.vlgmr.msra.gmra.mrb[0].mxu1 %vm136_vm1, %v120_v26 }
 0x1b9   :  { %v291_v28 = vpop.f32.mrb[0].mxu1 }
 0x1ba   :  { %v215_v30 = vadd.f32 %v291_v28, %v243_v27  ;;  %v209_v31 = vpop.f32.mrb[1].mxu1 }
 0x1bb   :  { %v210_v33 = vadd.f32 %v243_v27, %v209_v31 }
 0x1bc   :  { %v221_v34 = vadd.f32 %v219_v29, %v215_v30 }
 0x1bd   :  { %v220_v35 = vadd.f32 %v218_v32, %v210_v33 }
 0x1be   :  { %223 = vst.msk [vmem:[#allocation2 + $0x8] sm:$0xff] %vm37_vm0, %v221_v34 }
 0x1bf   :  { %222 = vst.msk [vmem:[#allocation2] sm:$0xff] %vm37_vm0, %v220_v35 }
 0x1c0   :  { %330 = shalt.err (!%p327_p4)
}
 0x1c1   :  { %s331_s9 = scalar_lea.hbm %s457_s6, 256 }
 0x1c2   :  { %p332_p5 = scmp.ne.s32.totalorder %s457_s6, %s331_s9  ;;  %p335_p6 = scmp.lt.u32.totalorder %s331_s9, %s457_s6 }
 0x1c4   :  { %p337_p7 = pnand %p335_p6, %p332_p5 }
 0x1c6   :  { %340 = shalt.err (!%p337_p7)
}
 0x1c7   :  { %s344_s1 = smov 128   ;;  %s345_s13 = smov 8  }
 0x1c8   :  { %235 = dma.vmem_to_hbm [thread:$0]  %s230_s2, 256, %s457_s6, [#allocation3], %s344_s1, %s344_s1, %s345_s13  }
 0x1c9   :  { %341 = dma.done.wait [#allocation3], 256  }
 0x1ca   :  { %342 = vsyncadd [#allocation3], 4294967040 }
 0x1cb   :  { %239 = vsyncpa [#allocation3], 1 }

</bundles_post_ra>
